<compile_context>
chip_gen: v7x
topology: tpu7x:2x2x1
jax: 0.10.0
libtpu: 0.0.40
codegen_flags: <defaults>
</compile_context>

<pallas_src>
import functools
import math

import numpy as np

import jax
import jax.numpy as jnp
from jax.experimental import pallas as pl
from jax.experimental.pallas import tpu as pltpu


# --------------------------------------------------------------------------
# VMEM / tiling planning
# --------------------------------------------------------------------------

def _round_up(x, m):
    return ((x + m - 1) // m) * m


def _sublane_unit(dtype) -> int:
    # Sub-32-bit dtypes pack along sublanes: 8 rows f32, 16 bf16, 32 int8.
    return max(8, 32 // max(1, np.dtype(dtype).itemsize))


def _padded_vmem_bytes(shape, dtype) -> int:
    """VMEM footprint of a block: lane dim -> mult. of 128, sublane dim -> dtype packing."""
    itemsize = np.dtype(dtype).itemsize
    dims = list(shape)
    if len(dims) >= 1:
        dims[-1] = _round_up(dims[-1], 128)
    if len(dims) >= 2:
        dims[-2] = _round_up(dims[-2], _sublane_unit(dtype))
    return int(math.prod(dims)) * itemsize


@functools.lru_cache(maxsize=None)
def _vmem_plan():
    """Returns (per-input-block byte budget, explicit scoped-VMEM limit)."""
    vmem_cap = None
    try:
        cap = getattr(pltpu.get_tpu_info(), "vmem_capacity_bytes", None)
        if cap:
            vmem_cap = int(cap)
    except Exception:
        vmem_cap = None
    if not vmem_cap:
        kind = ""
        try:
            kind = jax.devices()[0].device_kind.lower()
        except Exception:
            pass
        # v7x has 64 MiB VMEM per TensorCore; v5e/v6e have 128 MiB.
        vmem_cap = (64 << 20) if "v7" in kind else (128 << 20)
    # Leave headroom under physical VMEM: 96 MiB on v5e/v6e, 48 MiB on v7x.
    vmem_limit = int(min((vmem_cap * 3) // 4, 96 << 20))
    # Input blocks are double (or triple) buffered; output/acc blocks are tiny.
    block_budget = int(max(2 << 20, min(vmem_limit // 4, 16 << 20)))
    return block_budget, vmem_limit


def _batch_cap(B, unit):
    """Cap the batch tile so the batch grid axis has >= 2 blocks when possible
    (keeps both v7x TensorCores busy; one extra grid step is negligible on
    single-TC v5e/v6e)."""
    if B >= 2 * unit:
        return min(B, _round_up(pl.cdiv(B, 2), unit))
    return B


def _choose_tiles_mid(B, S, D, dtype, budget):
    """(tb, ts) for (B, S, D) blocks, D on lanes, reduction over sublane axis S."""
    itemsize = np.dtype(dtype).itemsize
    sub = _sublane_unit(dtype)
    lane_d = _round_up(D, 128)
    tb_cap = _batch_cap(B, 8)
    row_full = _round_up(S, sub) * lane_d * itemsize        # one padded full-S row
    if row_full * min(tb_cap, 8) <= budget:
        tb = min(tb_cap, max(1, budget // row_full))
        if tb < B:
            tb = max(8, (tb // 8) * 8)
        return tb, S
    # Must tile the reduction axis.  tb stays at min(B, 8): the output block's
    # sublane dim must be a multiple of 8 or the full B.  With multi-MiB
    # budgets the contiguous per-row HBM chunk ts*D*itemsize stays >> 4 KiB
    # because ts is sized against the lane-padded footprint.
    tb = min(B, 8)
    per_s = tb * lane_d * itemsize                           # padded bytes per S row
    ts = max(sub, (budget // per_s) // sub * sub)
    ts = min(ts, _round_up(S, sub))
    if ts >= S:
        ts = S
    return tb, ts


def _choose_tiles_last(B, S, dtype, budget):
    """(tb, ts) for (B, S) blocks, reduction over the lane axis S."""
    itemsize = np.dtype(dtype).itemsize
    sub = _sublane_unit(dtype)
    tb_cap = _batch_cap(B, sub)
    row_full = _round_up(S, 128) * itemsize
    if row_full * sub <= budget:                              # one padded sublane group fits
        groups = budget // (row_full * sub)
        tb = min(tb_cap, groups * sub)
        return max(1, tb), S
    tb = min(B, sub)
    per_s_col = sub * itemsize                                # tb < sub still pads to sub
    ts = max(128, (budget // per_s_col) // 128 * 128)
    ts = min(ts, _round_up(S, 128))
    if ts >= S:
        ts = S
    return tb, ts


def _make_in_spec(block_shape, index_map, multi_buffer):
    """Input BlockSpec; 3-deep pipeline for small, deeply tiled blocks."""
    if multi_buffer and hasattr(pl, "Buffered"):
        try:
            return pl.BlockSpec(block_shape, index_map, pipeline_mode=pl.Buffered(3))
        except TypeError:
            pass
    return pl.BlockSpec(block_shape, index_map)


# --------------------------------------------------------------------------
# Kernels
# --------------------------------------------------------------------------

def _mean_mid_kernel(x_ref, o_ref, acc_ref, *, inv_s, s_total, ts, defer, mask_tail):
    # x_ref: (tb, ts, D); o_ref: (tb, D);
    # acc_ref: (tb, 8, D) f32 when defer else (tb, D) f32.
    k = pl.program_id(1)

    @pl.when(k == 0)
    def _():
        acc_ref[...] = jnp.zeros_like(acc_ref)

    x = x_ref[...].astype(jnp.float32)
    if mask_tail:
        # Last reduction block may extend past S; zero the padded rows.
        s_idx = jax.lax.broadcasted_iota(jnp.int32, x.shape, 1)
        x = jnp.where(k * ts + s_idx < s_total, x, 0.0)
    tb, _, d = x.shape
    if defer:
        # Purely elementwise VPU adds; the cross-sublane XLU collapse is deferred.
        acc_ref[...] += x.reshape(tb, ts // 8, 8, d).sum(axis=1)
    else:
        acc_ref[...] += x.sum(axis=1)

    @pl.when(k == pl.num_programs(1) - 1)
    def _():
        total = acc_ref[...].sum(axis=1) if defer else acc_ref[...]
        o_ref[...] = (total * inv_s).astype(o_ref.dtype)


def _mean_last_kernel(x_ref, o_ref, acc_ref, *, inv_s, s_total, ts, defer, mask_tail):
    # x_ref: (tb, ts); o_ref: (tb, 1);
    # acc_ref: (tb, 128) f32 when defer else (tb, 1) f32.
    k = pl.program_id(1)

    @pl.when(k == 0)
    def _():
        acc_ref[...] = jnp.zeros_like(acc_ref)

    x = x_ref[...].astype(jnp.float32)
    if mask_tail:
        s_idx = jax.lax.broadcasted_iota(jnp.int32, x.shape, 1)
        x = jnp.where(k * ts + s_idx < s_total, x, 0.0)
    tb = x.shape[0]
    if defer:
        # Lane-dense partial sums; the single cross-lane XLU reduce is deferred.
        acc_ref[...] += x.reshape(tb, ts // 128, 128).sum(axis=1)
    else:
        acc_ref[...] += x.sum(axis=-1, keepdims=True)

    @pl.when(k == pl.num_programs(1) - 1)
    def _():
        total = acc_ref[...].sum(axis=-1, keepdims=True) if defer else acc_ref[...]
        o_ref[...] = (total * inv_s).astype(o_ref.dtype)


# --------------------------------------------------------------------------
# Wrappers
# --------------------------------------------------------------------------

def _avgpool_mid(x3, *, block_budget=None):
    """Mean over axis 1 of a (B, S, D) array (D > 1, lane-dense output)."""
    B, S, D = x3.shape
    budget, vmem_limit = _vmem_plan()
    if block_budget is not None:
        budget = block_budget
    tb, ts = _choose_tiles_mid(B, S, D, x3.dtype, budget)
    grid_b, grid_k = pl.cdiv(B, tb), pl.cdiv(S, ts)
    defer = (ts % 8 == 0)
    mask_tail = (S % ts != 0)
    acc_shape = (tb, 8, D) if defer else (tb, D)
    small_block = _padded_vmem_bytes((tb, ts, D), x3.dtype) < (2 << 20)
    in_spec = _make_in_spec((tb, ts, D), lambda b, k: (b, k, 0),
                            multi_buffer=(grid_k >= 3 and small_block))
    kernel = functools.partial(_mean_mid_kernel, inv_s=1.0 / S, s_total=S,
                               ts=ts, defer=defer, mask_tail=mask_tail)
    return pl.pallas_call(
        kernel,
        out_shape=jax.ShapeDtypeStruct((B, D), x3.dtype),
        grid_spec=pltpu.PrefetchScalarGridSpec(
            num_scalar_prefetch=0,
            grid=(grid_b, grid_k),
            in_specs=[in_spec],
            out_specs=pl.BlockSpec((tb, D), lambda b, k: (b, 0)),
            scratch_shapes=[pltpu.VMEM(acc_shape, jnp.float32)],
        ),
        compiler_params=pltpu.CompilerParams(
            dimension_semantics=("parallel", "arbitrary"),
            vmem_limit_bytes=vmem_limit),
    )(x3)


def _avgpool_last(x2, *, block_budget=None):
    """Mean over the last axis of a (B, S) array (lane-axis reduction)."""
    B, S = x2.shape
    budget, vmem_limit = _vmem_plan()
    if block_budget is not None:
        budget = block_budget
    tb, ts = _choose_tiles_last(B, S, x2.dtype, budget)
    grid_b, grid_k = pl.cdiv(B, tb), pl.cdiv(S, ts)
    defer = (ts % 128 == 0)
    mask_tail = (S % ts != 0)
    acc_shape = (tb, 128) if defer else (tb, 1)
    small_block = _padded_vmem_bytes((tb, ts), x2.dtype) < (2 << 20)
    in_spec = _make_in_spec((tb, ts), lambda b, k: (b, k),
                            multi_buffer=(grid_k >= 3 and small_block))
    kernel = functools.partial(_mean_last_kernel, inv_s=1.0 / S, s_total=S,
                               ts=ts, defer=defer, mask_tail=mask_tail)
    return pl.pallas_call(
        kernel,
        out_shape=jax.ShapeDtypeStruct((B, 1), x2.dtype),
        grid_spec=pltpu.PrefetchScalarGridSpec(
            num_scalar_prefetch=0,
            grid=(grid_b, grid_k),
            in_specs=[in_spec],
            out_specs=pl.BlockSpec((tb, 1), lambda b, k: (b, 0)),
            scratch_shapes=[pltpu.VMEM(acc_shape, jnp.float32)],
        ),
        compiler_params=pltpu.CompilerParams(
            dimension_semantics=("parallel", "arbitrary"),
            vmem_limit_bytes=vmem_limit),
    )(x2)


class AvgPool:
    """Averages over a specified dimension (Pallas TPU version)."""

    def __init__(self, dim: int):
        self.dim = dim

    def __call__(self, x):
        ndim = x.ndim
        dim = self.dim % ndim
        B = int(math.prod(x.shape[:dim])) if dim > 0 else 1
        S = int(x.shape[dim])
        rest = x.shape[dim + 1:]
        D = int(math.prod(rest)) if rest else 1
        out_shape = x.shape[:dim] + rest

        if S == 1:
            # Mean over a size-1 axis is a pure reshape; no kernel needed.
            return x.reshape(out_shape)

        if D == 1:
            out = _avgpool_last(x.reshape(B, S))
        else:
            out = _avgpool_mid(x.reshape(B, S, D))
        return out.reshape(out_shape)

    def extra_repr(self) -> str:
        return f"dim={self.dim}"


if __name__ == "__main__":
    root = jax.random.PRNGKey(0)
    k0, k1, k2 = jax.random.split(root, 3)
    x = jax.random.normal(k0, (2, 4, 16, 16), dtype=jnp.float32)

    # 1) Mean over a middle dimension (mid path) -> (2, 16, 16).
    out1 = jax.block_until_ready(AvgPool(dim=1)(x))
    ref1 = jnp.mean(x, axis=1)
    assert out1.shape == ref1.shape, (out1.shape, ref1.shape)
    assert jnp.allclose(out1, ref1, atol=1e-5, rtol=1e-5), "dim=1 mismatch"

    # 2) Mean over the last dimension (lane-reduce path) -> (2, 4, 16).
    out2 = jax.block_until_ready(AvgPool(dim=-1)(x))
    ref2 = jnp.mean(x, axis=-1)
    assert out2.shape == ref2.shape, (out2.shape, ref2.shape)
    assert jnp.allclose(out2, ref2, atol=1e-5, rtol=1e-5), "dim=-1 mismatch"

    # 3) bf16 input, mid path with deferred sublane collapse -> (2, 4, 16).
    xb = x.astype(jnp.bfloat16)
    out3 = jax.block_until_ready(AvgPool(dim=2)(xb))
    ref3 = jnp.mean(xb.astype(jnp.float32), axis=2).astype(jnp.bfloat16)
    assert out3.shape == ref3.shape, (out3.shape, ref3.shape)
    assert jnp.allclose(out3.astype(jnp.float32), ref3.astype(jnp.float32),
                        atol=2e-2, rtol=2e-2), "dim=2 bf16 mismatch"

    # 4) Tiled reduction + tail mask + multi-buffered pipeline on the mid path
    #    (tiny block budget forces the tiled path on a small array).
    x4 = jax.random.normal(k1, (16, 180, 8), dtype=jnp.float32)
    out4 = jax.block_until_ready(_avgpool_mid(x4, block_budget=64 * 1024))
    ref4 = jnp.mean(x4, axis=1)
    assert out4.shape == ref4.shape, (out4.shape, ref4.shape)
    assert jnp.allclose(out4, ref4, atol=1e-5, rtol=1e-5), "tiled mid mismatch"

    # 5) Tiled reduction + tail mask on the last-dim (lane) path.
    x5 = jax.random.normal(k2, (8, 650), dtype=jnp.float32)
    out5 = jax.block_until_ready(_avgpool_last(x5, block_budget=4 * 1024))
    ref5 = jnp.mean(x5, axis=-1, keepdims=True)
    assert out5.shape == ref5.shape, (out5.shape, ref5.shape)
    assert jnp.allclose(out5, ref5, atol=1e-5, rtol=1e-4), "tiled last mismatch"

    print("KERNEL_OK")
</pallas_src>

<mosaic_0001>
module attributes {stable_mosaic.version = 11 : i64} {
  func.func @_mean_mid_kernel(%arg0: i32, %arg1: i32, %arg2: memref<2x4x256xf32, #tpu.memory_space<vmem>>, %arg3: memref<2x256xf32, #tpu.memory_space<vmem>>, %arg4: memref<2x256xf32, #tpu.memory_space<vmem>>) attributes {dimension_semantics = [#tpu.dimension_semantics<parallel>, #tpu.dimension_semantics<arbitrary>], iteration_bounds = array<i64: 1, 1>, scalar_prefetch = 0 : i64, scratch_operands = 1 : i64, tpu.core_type = #tpu.core_type<tc>, window_params = [{transform_indices = @transform_0, window_bounds = array<i64: 2, 4, 256>}, {transform_indices = @transform_1, window_bounds = array<i64: 2, 256>}]} {
    %c0_i32 = arith.constant 0 : i32
    %0 = arith.cmpi eq, %arg1, %c0_i32 : i32
    %1 = arith.extui %0 : i1 to i32
    %c0_i32_0 = arith.constant 0 : i32
    %2 = arith.cmpi ne, %1, %c0_i32_0 : i32
    scf.if %2 {
      %cst_9 = arith.constant 0.000000e+00 : f32
      %11 = vector.broadcast %cst_9 : f32 to vector<2x256xf32>
      %c0_10 = arith.constant 0 : index
      %c0_11 = arith.constant 0 : index
      %12 = vector.load %arg4[%c0_10, %c0_11] : memref<2x256xf32, #tpu.memory_space<vmem>>, vector<2x256xf32>
      tpu.vector_store %arg4[%c0_10, %c0_11], %11 {strides = array<i32>} : memref<2x256xf32, #tpu.memory_space<vmem>>, vector<2x256xf32>,
    } else {
    }
    %c0 = arith.constant 0 : index
    %c0_1 = arith.constant 0 : index
    %c0_2 = arith.constant 0 : index
    %3 = vector.load %arg2[%c0, %c0_1, %c0_2] : memref<2x4x256xf32, #tpu.memory_space<vmem>>, vector<2x4x256xf32>
    %c0_3 = arith.constant 0 : index
    %c0_4 = arith.constant 0 : index
    %4 = vector.load %arg4[%c0_3, %c0_4] : memref<2x256xf32, #tpu.memory_space<vmem>>, vector<2x256xf32>
    %cst = arith.constant dense<0.000000e+00> : vector<2x256xf32>
    %5 = vector.multi_reduction <add>, %3, %cst [1] : vector<2x4x256xf32> to vector<2x256xf32>
    %6 = arith.addf %4, %5 : vector<2x256xf32>
    %c0_5 = arith.constant 0 : index
    %c0_6 = arith.constant 0 : index
    %7 = vector.load %arg4[%c0_5, %c0_6] : memref<2x256xf32, #tpu.memory_space<vmem>>, vector<2x256xf32>
    tpu.vector_store %arg4[%c0_5, %c0_6], %6 {strides = array<i32>} : memref<2x256xf32, #tpu.memory_space<vmem>>, vector<2x256xf32>,
    %c0_i32_7 = arith.constant 0 : i32
    %8 = arith.cmpi eq, %arg1, %c0_i32_7 : i32
    %9 = arith.extui %8 : i1 to i32
    %c0_i32_8 = arith.constant 0 : i32
    %10 = arith.cmpi ne, %9, %c0_i32_8 : i32
    scf.if %10 {
      %c0_9 = arith.constant 0 : index
      %c0_10 = arith.constant 0 : index
      %11 = vector.load %arg4[%c0_9, %c0_10] : memref<2x256xf32, #tpu.memory_space<vmem>>, vector<2x256xf32>
      %cst_11 = arith.constant 2.500000e-01 : f32
      %12 = vector.broadcast %cst_11 : f32 to vector<2x256xf32>
      %13 = arith.mulf %11, %12 : vector<2x256xf32>
      %c0_12 = arith.constant 0 : index
      %c0_13 = arith.constant 0 : index
      %14 = vector.load %arg3[%c0_12, %c0_13] : memref<2x256xf32, #tpu.memory_space<vmem>>, vector<2x256xf32>
      tpu.vector_store %arg3[%c0_12, %c0_13], %13 {strides = array<i32>} : memref<2x256xf32, #tpu.memory_space<vmem>>, vector<2x256xf32>,
    } else {
    }
    return
  }
  func.func @transform_0(%arg0: i32, %arg1: i32) -> (i32, i32, i32) {
    %c0_i32 = arith.constant 0 : i32
    %c0_i32_0 = arith.constant 0 : i32
    return %arg0, %arg1, %c0_i32 : i32, i32, i32
  }
  func.func @transform_1(%arg0: i32, %arg1: i32) -> (i32, i32) {
    %c0_i32 = arith.constant 0 : i32
    %c0_i32_0 = arith.constant 0 : i32
    return %arg0, %c0_i32 : i32, i32
  }
}

</mosaic_0001>

<bundles_post_ra>
// kernel: tpu_custom_call.1
= control target key start
LH: loop header
LB: loop body
LE: loop exit
PB: predicated region body
PF: predicated region fallthrough
CT: control target
= control target key end

     0   :  { %6 = vsyncpa [#allocation4], 0  ;;  %s219_s0 = inlined_call_operand.hbm [shape: f32[2,4,256], index: 0, kind: input, shape index: {}]   ;;  %s220_s1 = inlined_call_operand.hbm [shape: f32[2,256], index: 1, kind: output, shape index: {}]  }
   0x1   :  { %7 = vsyncpa [#allocation5], 0  ;;  %s179_s6 = smov [#allocation3]   ;;  %s131_s10 = scalar_lea.hbm %s219_s0, 256 }
   0x2   :  { %s13_s7 = sshll.u32 %s179_s6, 4  ;;  %p132_p0 = scmp.ne.s32.totalorder %s219_s0, %s131_s10  ;;  %s14_s7 = int_to_ptr.vmem [resolvable:$true] %s13_s7 }
   0x3   :  { %p135_p1 = scmp.lt.u32.totalorder %s131_s10, %s219_s0 }
   0x5   :  { %p137_p2 = pnand %p135_p1, %p132_p0 }
   0x7   :  { %140 = shalt.err (!%p137_p2)
}
   0x8   :  { %s141_s15 = scalar_lea.vmem %s14_s7, 256  ;;  %p146_p4 = scmp.lt.s32.totalorder %s14_s7, %s14_s7 }
   0x9   :  { %p142_p3 = scmp.ne.s32.totalorder %s14_s7, %s141_s15  ;;  %p147_p5 = scmp.lt.s32.totalorder %s141_s15, %s141_s15 }
   0xb   :  { %p148_p6 = por %p147_p5, %p146_p4 }
   0xd   :  { %p149_p7 = pnand %p148_p6, %p142_p3 }
   0xf   :  { %152 = shalt.err (!%p149_p7)
}
  0x10   :  { %s180_s16 = smov 128   ;;  %s181_s17 = smov 8  }
  0x11   :  { %19 = dma.hbm_to_vmem [thread:$0]  %s219_s0, 256, %s14_s7, [#allocation4], %s180_s16, %s180_s16, %s181_s17  }
  0x12   :  { %175 = dma.done.wait [#allocation4], 256  }
  0x13   :  { %176 = vsyncadd [#allocation4], 4294967040  ;;  %v182_v0 = vmov 0.0   ;;  %vm37_vm0 = vcmask 1043456   ;;  %v28_v1 = vld [vmem:[#allocation3] sm:$0xff]  ;;  %v29_v2 = vld [vmem:[#allocation3 + $0x8] sm:$0xff]  ;;  %v74_v17 = vlaneseq }
  0x14   :  { %27 = vst [vmem:[#allocation2] sm:$0xf] %v182_v0  ;;  %v33_v3 = vcombine.high %v28_v1, %v28_v1  ;;  %v34_v4 = vcombine.high %v29_v2, %v29_v2  ;;  %v38_v5 = vsel %vm37_vm0, %v28_v1, 0.0  ;;  %v52_v6 = vsel %vm37_vm0, %v29_v2, 0.0  ;;  %s184_s0 = smov [#allocation6]  }
  0x15   :  { %v39_v7 = vrot.slane %v38_v5, 4  ;;  %v53_v8 = vrot.slane %v52_v6, 4  ;;  %v183_v15 = vmov 1983009808   ;;  %v75_v27 = vshrl.u32 %v74_v17, 7  ;;  %s114_s20 = sshll.u32 %s184_s0, 4  ;;  %s115_s20 = int_to_ptr.vmem [resolvable:$true] %s114_s20 }
  0x16   :  { %v45_v9 = vsel %vm37_vm0, %v33_v3, 0.0  ;;  %v59_v10 = vsel %vm37_vm0, %v34_v4, 0.0  ;;  %v72_v16 = vunpack.c.l.s4 %v183_v15  ;;  %vm91_vm1 = vcmask 1041409   ;;  %s153_s21 = scalar_lea.vmem %s115_s20, 64  ;;  %p158_p9 = scmp.lt.s32.totalorder %s115_s20, %s115_s20 }
  0x17   :  { %v40_v11 = vadd.f32 %v39_v7, %v38_v5  ;;  %v46_v12 = vrot.slane %v45_v9, 4  ;;  %v54_v13 = vadd.f32 %v53_v8, %v52_v6  ;;  %v60_v14 = vrot.slane %v59_v10, 4  ;;  %p154_p8 = scmp.ne.s32.totalorder %s115_s20, %s153_s21  ;;  %p159_p10 = scmp.lt.s32.totalorder %s153_s21, %s153_s21 }
  0x18   :  { %v73_v26 = vunpack.c.0.s8 %v72_v16  ;;  %vm93_vm2 = vcmask 1043459   ;;  %vm95_vm3 = vcmask 1045509   ;;  %vm97_vm4 = vcmask 1047559  }
  0x19   :  { %v41_v18 = vrot.slane %v40_v11, 2  ;;  %v47_v19 = vadd.f32 %v46_v12, %v45_v9  ;;  %v55_v20 = vrot.slane %v54_v13, 2  ;;  %v61_v21 = vadd.f32 %v60_v14, %v59_v10  ;;  %p160_p11 = por %p159_p10, %p158_p9 }
  0x1a   :  { %v76_v38 = vsub.s32 %v73_v26, %v75_v27 }
  0x1b   :  { %v42_v22 = vadd.f32 %v41_v18, %v40_v11  ;;  %v48_v23 = vrot.slane %v47_v19, 2  ;;  %v56_v24 = vadd.f32 %v55_v20, %v54_v13  ;;  %v62_v25 = vrot.slane %v61_v21, 2  ;;  %v30_v45 = vld [vmem:[#allocation2] sm:$0xf]  ;;  %p161_p12 = pnand %p160_p11, %p154_p8 }
  0x1d   :  { %v43_v28 = vrot.slane %v42_v22, 1  ;;  %v49_v29 = vadd.f32 %v48_v23, %v47_v19  ;;  %v57_v30 = vrot.slane %v56_v24, 1  ;;  %v63_v31 = vadd.f32 %v62_v25, %v61_v21 }
  0x1f   :  { %v44_v32 = vadd.f32 %v43_v28, %v42_v22  ;;  %v50_v33 = vrot.slane %v49_v29, 1  ;;  %v58_v34 = vadd.f32 %v57_v30, %v56_v24  ;;  %v64_v35 = vrot.slane %v63_v31, 1 }
  0x21   :  { %v51_v36 = vadd.f32 %v50_v33, %v49_v29  ;;  %v65_v37 = vadd.f32 %v64_v35, %v63_v31 }
  0x23   :  { %v70_v39 = vcombine.low %v44_v32, %v51_v36  ;;  %v78_v40 = vcombine.low %v58_v34, %v65_v37 }
  0x25   :  { %v77_v41 = vrot.slane %v70_v39, %v76_v38  ;;  %v85_v42 = vrot.slane %v78_v40, %v76_v38 }
  0x27   :  { %v90_v43 = vrot.slane %v85_v42, 7 }
  0x29   :  { %v92_v44 = vsel %vm91_vm1, %v90_v43, %v77_v41 }
  0x2a   :  { %v94_v46 = vsel %vm93_vm2, %v90_v43, %v92_v44 }
  0x2b   :  { %v96_v47 = vsel %vm95_vm3, %v90_v43, %v94_v46 }
  0x2c   :  { %v98_v48 = vsel %vm97_vm4, %v90_v43, %v96_v47 }
  0x2d   :  { %v100_v49 = vadd.f32 %v98_v48, %v30_v45 }
  0x2f   :  { %101 = vst [vmem:[#allocation2] sm:$0xf] %v100_v49 }
  0x36   :  { %v105_v50 = vld [vmem:[#allocation2] sm:$0xf] }
  0x37   :  { %v106_v51 = vmul.f32 0.25, %v105_v50 }
  0x39   :  { %107 = vst [vmem:[#allocation6] sm:$0xf] %v106_v51 }
  0x3a   :  { %164 = shalt.err (!%p161_p12)
}
  0x3b   :  { %s165_s24 = scalar_lea.hbm %s220_s1, 64 }
  0x3c   :  { %p166_p13 = scmp.ne.s32.totalorder %s220_s1, %s165_s24  ;;  %p169_p0 = scmp.lt.u32.totalorder %s165_s24, %s220_s1 }
  0x3e   :  { %p171_p1 = pnand %p169_p0, %p166_p13 }
  0x40   :  { %174 = shalt.err (!%p171_p1)
}
  0x41   :  { %117 = dma.vmem_to_hbm [thread:$0]  %s115_s20, 64, %s220_s1, [#allocation5]  }
  0x42   :  { %177 = dma.done.wait [#allocation5], 64  }
  0x43   :  { %178 = vsyncadd [#allocation5], 4294967232 }
  0x44   :  { %121 = vsyncpa [#allocation4], 1 }
  0x45   :  { %122 = vsyncpa [#allocation5], 1 }

</bundles_post_ra>
